<compile_context>
chip_gen: v7x
topology: tpu7x:2x2x1
jax: 0.10.0
libtpu: 0.0.40
codegen_flags: <defaults>
</compile_context>

<pallas_src>
import functools

import jax
import jax.numpy as jnp
from jax.experimental import pallas as pl
from jax.experimental.pallas import tpu as pltpu

_LANES = 128
_EPS = 1e-6
_MAX_TILE_ROWS = 4096          # ~2 MiB of f32 per input tile
_SMALL_ROWS = 256              # below this: single tile spanning the array


def _round_up(x, m):
    return ((x + m - 1) // m) * m


def _tail_mask(shape, last_tile_valid):
    """Bool mask: local flat index (row*128 + lane) < last_tile_valid."""
    tr, lanes = shape
    lidx = (jax.lax.broadcasted_iota(jnp.int32, (tr, lanes), 0) * lanes
            + jax.lax.broadcasted_iota(jnp.int32, (tr, lanes), 1))
    return lidx < last_tile_valid


def _charbonnier_kernel(d_ref, out_ref, *, last_tile_valid):
    """Partial sum of sqrt(d^2 + eps) over one (TR, 128) tile (mask=None)."""
    i = pl.program_id(0)
    last = pl.num_programs(0) - 1

    d = d_ref[...].astype(jnp.float32)
    y = d * d + _EPS
    v = y * jax.lax.rsqrt(y)          # == sqrt(y): 1 EUP + 1 VPU op per vreg

    @pl.when(i < last)
    def _():                          # interior tile: no masking in hot path
        out_ref[0, 0] = jnp.sum(v)

    @pl.when(i == last)
    def _():                          # ragged last tile: NaN-safe select mask
        valid = _tail_mask(d.shape, last_tile_valid)
        out_ref[0, 0] = jnp.sum(jnp.where(valid, v, 0.0))


def _charbonnier_masked_kernel(d_ref, m_ref, num_ref, den_ref, *, last_tile_valid):
    """Partial numerator / denominator sums for the masked path."""
    i = pl.program_id(0)
    last = pl.num_programs(0) - 1

    d = d_ref[...].astype(jnp.float32)
    m = m_ref[...].astype(jnp.float32)     # mask kept narrow in HBM, cast in VMEM
    y = d * d + _EPS
    v = y * jax.lax.rsqrt(y)

    @pl.when(i < last)
    def _():
        num_ref[0, 0] = jnp.sum(v * m)
        den_ref[0, 0] = jnp.sum(m)

    @pl.when(i == last)
    def _():
        valid = _tail_mask(d.shape, last_tile_valid)
        num_ref[0, 0] = jnp.sum(jnp.where(valid, v * m, 0.0))
        den_ref[0, 0] = jnp.sum(jnp.where(valid, m, 0.0))


def _lane_layout(rows):
    """Pick (tile_rows, num_tiles) for a lane-dense (rows, 128) array."""
    if rows <= _SMALL_ROWS:
        # Single tile whose block equals the array row extent (no (8,128)
        # divisibility requirement when the block spans the full dim).
        return rows, 1
    # >= 2 grid steps (v7x megacore / DMA-compute overlap); tile rows are a
    # multiple of 32 sublanes (bf16/int8 packing friendly since inputs stay in
    # their native dtype through HBM); capped at ~2 MiB of f32 per tile.
    tile_rows = min(_MAX_TILE_ROWS, _round_up(-(-rows // 2), 32))
    return tile_rows, -(-rows // tile_rows)


def _as_lane_major(x):
    """Flatten to (rows, 128). Copy-free when x.size % 128 == 0.

    Only the ragged case pays a pad-copy, and only by the minimal <128-element
    tail (never up to a full tile).
    """
    flat = x.reshape(-1)
    rem = flat.size % _LANES
    if rem:
        flat = jnp.pad(flat, (0, _LANES - rem))
    return flat.reshape(-1, _LANES)


def charbonnier_l1(diff, mask=None):
    """Pallas equivalent of Charbonnier_L1().forward(diff, mask)."""
    n = diff.size
    rows = max(-(-n // _LANES), 1)
    tile_rows, num_tiles = _lane_layout(rows)
    last_tile_valid = n - (num_tiles - 1) * tile_rows * _LANES  # static python int

    d2 = _as_lane_major(diff)

    tile_spec = pl.BlockSpec((tile_rows, _LANES), lambda i: (i, 0))
    # One SMEM slot per grid step; long axis last keeps SMEM padding tiny.
    part_spec = pl.BlockSpec((1, 1), lambda i: (0, i), memory_space=pltpu.SMEM)
    part_shape = jax.ShapeDtypeStruct((1, num_tiles), jnp.float32)
    cparams = pltpu.CompilerParams(
        dimension_semantics=("parallel",),
        vmem_limit_bytes=32 * 1024 * 1024,   # headroom for v5e's 16 MiB default
    )

    if mask is None:
        kernel = functools.partial(_charbonnier_kernel,
                                   last_tile_valid=last_tile_valid)
        partials = pl.pallas_call(
            kernel,
            out_shape=part_shape,
            grid_spec=pltpu.PrefetchScalarGridSpec(
                num_scalar_prefetch=0,
                grid=(num_tiles,),
                in_specs=[tile_spec],
                out_specs=part_spec,
            ),
            compiler_params=cparams,
        )(d2)
        return jnp.sum(partials) / jnp.float32(n)

    if mask.shape != diff.shape:
        # Mean of a broadcast mask equals mean of the original mask, so this
        # preserves the PyTorch semantics for broadcastable masks.
        mask = jnp.broadcast_to(mask, diff.shape)
    # Mask stays in its native (possibly narrow) dtype through HBM.
    m2 = _as_lane_major(mask)

    kernel = functools.partial(_charbonnier_masked_kernel,
                               last_tile_valid=last_tile_valid)
    num, den = pl.pallas_call(
        kernel,
        out_shape=(part_shape, part_shape),
        grid_spec=pltpu.PrefetchScalarGridSpec(
            num_scalar_prefetch=0,
            grid=(num_tiles,),
            in_specs=[tile_spec, tile_spec],
            out_specs=(part_spec, part_spec),
        ),
        compiler_params=cparams,
    )(d2, m2)
    # loss = mean(sqrt * mask) / (mean(mask) + 1e-9)
    return (jnp.sum(num) / jnp.float32(n)) / (jnp.sum(den) / jnp.float32(n) + 1e-9)


if __name__ == "__main__":
    key = jax.random.PRNGKey(0)
    kx, km, kr = jax.random.split(key, 3)
    x = jax.random.normal(kx, (2, 4, 16, 16), dtype=jnp.float32)

    # mask=None path (size divisible by 128 -> copy-free layout)
    loss = jax.block_until_ready(jax.jit(charbonnier_l1)(x))
    ref = jnp.mean(jnp.sqrt(x * x + 1e-6))
    assert jnp.allclose(loss, ref, rtol=1e-5, atol=1e-6), (loss, ref)

    # masked path
    mask = (jax.random.uniform(km, x.shape) > 0.5).astype(jnp.float32)
    loss_m = jax.block_until_ready(jax.jit(charbonnier_l1)(x, mask))
    ref_m = jnp.mean(jnp.sqrt(x * x + 1e-6) * mask) / (jnp.mean(mask) + 1e-9)
    assert jnp.allclose(loss_m, ref_m, rtol=1e-5, atol=1e-6), (loss_m, ref_m)

    # ragged path (size % 128 != 0) exercises the in-kernel tail mask
    y = jax.random.normal(kr, (3, 5, 7, 11), dtype=jnp.float32)
    loss_r = jax.block_until_ready(jax.jit(charbonnier_l1)(y))
    ref_r = jnp.mean(jnp.sqrt(y * y + 1e-6))
    assert jnp.allclose(loss_r, ref_r, rtol=1e-5, atol=1e-6), (loss_r, ref_r)

    print("KERNEL_OK")
</pallas_src>

<mosaic_0001>
module attributes {stable_mosaic.version = 11 : i64} {
  func.func @_charbonnier_kernel(%arg0: i32, %arg1: memref<16x128xf32, #tpu.memory_space<vmem>>, %arg2: memref<1x1xf32, #tpu.memory_space<smem>>) attributes {dimension_semantics = [#tpu.dimension_semantics<parallel>], iteration_bounds = array<i64: 1>, scalar_prefetch = 0 : i64, scratch_operands = 0 : i64, tpu.core_type = #tpu.core_type<tc>, window_params = [{transform_indices = @transform_0, window_bounds = array<i64: 16, 128>}, {transform_indices = @transform_1, window_bounds = array<i64: 1, 1>}]} {
    %c0 = arith.constant 0 : index
    %c0_0 = arith.constant 0 : index
    %0 = vector.load %arg1[%c0, %c0_0] : memref<16x128xf32, #tpu.memory_space<vmem>>, vector<16x128xf32>
    %1 = arith.mulf %0, %0 : vector<16x128xf32>
    %cst = arith.constant 9.99999997E-7 : f32
    %2 = vector.broadcast %cst : f32 to vector<16x128xf32>
    %3 = arith.addf %1, %2 : vector<16x128xf32>
    %4 = math.rsqrt %3 : vector<16x128xf32>
    %5 = arith.mulf %3, %4 : vector<16x128xf32>
    %c0_i32 = arith.constant 0 : i32
    %6 = arith.cmpi slt, %arg0, %c0_i32 : i32
    %7 = arith.extui %6 : i1 to i32
    %c0_i32_1 = arith.constant 0 : i32
    %8 = arith.cmpi ne, %7, %c0_i32_1 : i32
    scf.if %8 {
      %12 = vector.shape_cast %5 : vector<16x128xf32> to vector<1x16x128xf32>
      %cst_4 = arith.constant dense<0.000000e+00> : vector<1xf32>
      %13 = vector.multi_reduction <add>, %12, %cst_4 [1, 2] : vector<1x16x128xf32> to vector<1xf32>
      %14 = vector.shape_cast %13 : vector<1xf32> to vector<1x1x1xf32>
      %15 = vector.extract %14[0, 0, 0] : f32 from vector<1x1x1xf32>
      %c0_5 = arith.constant 0 : index
      %c0_6 = arith.constant 0 : index
      %16 = memref.load %arg2[%c0_5, %c0_6] : memref<1x1xf32, #tpu.memory_space<smem>>
      memref.store %15, %arg2[%c0_5, %c0_6] : memref<1x1xf32, #tpu.memory_space<smem>>
    } else {
    }
    %c0_i32_2 = arith.constant 0 : i32
    %9 = arith.cmpi eq, %arg0, %c0_i32_2 : i32
    %10 = arith.extui %9 : i1 to i32
    %c0_i32_3 = arith.constant 0 : i32
    %11 = arith.cmpi ne, %10, %c0_i32_3 : i32
    scf.if %11 {
      %12 = tpu.iota {dimensions = array<i32: 0>} : vector<16x128xi32>
      %c128_i32 = arith.constant 128 : i32
      %13 = vector.broadcast %c128_i32 : i32 to vector<16x128xi32>
      %14 = arith.muli %12, %13 : vector<16x128xi32>
      %15 = tpu.iota {dimensions = array<i32: 1>} : vector<16x128xi32>
      %16 = arith.addi %14, %15 : vector<16x128xi32>
      %c2048_i32 = arith.constant 2048 : i32
      %17 = vector.broadcast %c2048_i32 : i32 to vector<16x128xi32>
      %18 = arith.cmpi slt, %16, %17 : vector<16x128xi32>
      %cst_4 = arith.constant 0.000000e+00 : f32
      %19 = vector.broadcast %cst_4 : f32 to vector<16x128xf32>
      %20 = arith.select %18, %5, %19 : vector<16x128xi1>, vector<16x128xf32>
      %21 = vector.shape_cast %20 : vector<16x128xf32> to vector<1x16x128xf32>
      %cst_5 = arith.constant dense<0.000000e+00> : vector<1xf32>
      %22 = vector.multi_reduction <add>, %21, %cst_5 [1, 2] : vector<1x16x128xf32> to vector<1xf32>
      %23 = vector.shape_cast %22 : vector<1xf32> to vector<1x1x1xf32>
      %24 = vector.extract %23[0, 0, 0] : f32 from vector<1x1x1xf32>
      %c0_6 = arith.constant 0 : index
      %c0_7 = arith.constant 0 : index
      %25 = memref.load %arg2[%c0_6, %c0_7] : memref<1x1xf32, #tpu.memory_space<smem>>
      memref.store %24, %arg2[%c0_6, %c0_7] : memref<1x1xf32, #tpu.memory_space<smem>>
    } else {
    }
    return
  }
  func.func @transform_0(%arg0: i32) -> (i32, i32) {
    %c0_i32 = arith.constant 0 : i32
    %c0_i32_0 = arith.constant 0 : i32
    return %arg0, %c0_i32 : i32, i32
  }
  func.func @transform_1(%arg0: i32) -> (i32, i32) {
    %c0_i32 = arith.constant 0 : i32
    %c0_i32_0 = arith.constant 0 : i32
    return %c0_i32, %arg0 : i32, i32
  }
}

</mosaic_0001>

<bundles_post_ra>
// kernel: charbonnier_l1.1
= control target key start
LH: loop header
LB: loop body
LE: loop exit
PB: predicated region body
PF: predicated region fallthrough
CT: control target
= control target key end

     0   :  { %v39_v2 = vlaneseq  ;;  %s125_s0 = inlined_call_operand.vmem [shape: f32[16,128], index: 0, kind: input, shape index: {}]   ;;  %s126_s1 = inlined_call_operand.hbm [shape: f32[1,1], index: 1, kind: output, shape index: {}]  }
   0x1   :  { %v9_v0 = vld [vmem:[%s125_s0] sm:$0xff]  ;;  %v10_v1 = vld [vmem:[%s125_s0 + $0x8] sm:$0xff] }
   0x2   :  { %6 = vsyncpa [#allocation3], 0  ;;  %v11_v3 = vmul.f32 %v9_v0, %v9_v0  ;;  %v12_v4 = vmul.f32 %v10_v1, %v10_v1  ;;  %v40_v5 = vshrl.u32 %v39_v2, 7  ;;  %v45_v10 = vand.u32 127, %v39_v2  ;;  %s84_s12 = scalar_lea.hbm %s126_s1, 16 }
   0x3   :  { %p85_p0 = scmp.ne.s32.totalorder %s126_s1, %s84_s12  ;;  %p88_p1 = scmp.lt.u32.totalorder %s84_s12, %s126_s1 }
   0x4   :  { %v13_v6 = vadd.f32 1e-06, %v11_v3  ;;  %v14_v7 = vadd.f32 1e-06, %v12_v4  ;;  %v41_v8 = vadd.s32 8, %v40_v5  ;;  %v42_v9 = vmul.u32 128, %v40_v5 }
   0x5   :  { %p90_p2 = pnand %p88_p1, %p85_p0 }
   0x6   :  { %80 = vrsqrt.f32 %v13_v6  ;;  %v43_v11 = vmul.u32 128, %v41_v8  ;;  %v46_v12 = vadd.s32 %v45_v10, %v42_v9 }
   0x7   :  { %82 = vrsqrt.f32 %v14_v7 }
   0x8   :  { %v47_v13 = vadd.s32 %v45_v10, %v43_v11  ;;  %vm48_vm0 = vcmp.lt.s32.totalorder %v46_v12, 2048 }
   0xa   :  { %vm49_vm1 = vcmp.lt.s32.totalorder %v47_v13, 2048 }
  0x10   :  { %v81_v14 = vpop.eup %80 }
  0x11   :  { %v83_v15 = vpop.eup %82  ;;  %v17_v16 = vmul.f32 %v81_v14, %v13_v6 }
  0x12   :  { %v18_v17 = vmul.f32 %v83_v15, %v14_v7 }
  0x13   :  { %v50_v18 = vsel %vm48_vm0, %v17_v16, 0.0 }
  0x14   :  { %v51_v19 = vsel %vm49_vm1, %v18_v17, 0.0 }
  0x15   :  { %v52_v20 = vadd.f32 %v51_v19, %v50_v18 }
  0x17   :  { %53 = vadd.xlane.f32.xlu0 %v52_v20 }
  0xa4   :  { %v54_v21 = vpop.xlane.xlu0 %53 }
  0xa5   :  { %v55_v22 = vrot.slane %v54_v21, 4 }
  0xa7   :  { %v56_v23 = vadd.f32 %v55_v22, %v54_v21 }
  0xa9   :  { %v57_v24 = vrot.slane %v56_v23, 2 }
  0xab   :  { %v58_v25 = vadd.f32 %v57_v24, %v56_v23 }
  0xad   :  { %v59_v26 = vrot.slane %v58_v25, 1 }
  0xaf   :  { %v60_v27 = vadd.f32 %v59_v26, %v58_v25 }
  0xb1   :  { %77 = vpush %v60_v27 }
  0xe2   :  { %s78_s0 = spop %77 }
  0xe3   :  { %63 = sst [smem:[#allocation2]] %s78_s0 }
  0xe4   :  { %93 = shalt.err (!%p90_p2)
}
  0xe5   :  { %s96_s17 = smov [#allocation2]  }
  0xe6   :  { %71 = dma.smem_to_hbm %s96_s17, 16, %s126_s1, [#allocation3]  }
  0xe7   :  { %94 = dma.done.wait [#allocation3], 16  }
  0xe8   :  { %95 = vsyncadd [#allocation3], 4294967280 }
  0xe9   :  { %75 = sfence }
  0xea   :  { %76 = vsyncpa [#allocation3], 1 }

</bundles_post_ra>
